<compile_context>
chip_gen: v6e
topology: v6e:2x2x1
jax: 0.10.0
libtpu: 0.0.40
codegen_flags: <defaults>
</compile_context>

<pallas_src>
import math

import jax
import jax.numpy as jnp
from jax.experimental import pallas as pl
from jax.experimental.pallas import tpu as pltpu


# --------------------------------------------------------------------------
# Parameter setup (PyTorch __init__ equivalent) — plain JAX, done once.
# --------------------------------------------------------------------------
def make_pe(d_model: int, height: int = 16, width: int = 16) -> jnp.ndarray:
    """Reproduces the PyTorch __init__ pe buffer, shape (1, d_model, H, W)."""
    if d_model % 4 != 0:
        raise ValueError("d_model must be divisible by 4")
    dm = d_model // 2
    div_term = jnp.exp(
        jnp.arange(0.0, dm, 2, dtype=jnp.float32) * -(math.log(10000.0) / dm)
    )  # (dm//2,)
    pos_w = jnp.arange(0.0, width, dtype=jnp.float32)[:, None]   # (W, 1)
    pos_h = jnp.arange(0.0, height, dtype=jnp.float32)[:, None]  # (H, 1)

    sw = jnp.broadcast_to(jnp.sin(pos_w * div_term).T[:, None, :],
                          (dm // 2, height, width))
    cw = jnp.broadcast_to(jnp.cos(pos_w * div_term).T[:, None, :],
                          (dm // 2, height, width))
    sh = jnp.broadcast_to(jnp.sin(pos_h * div_term).T[:, :, None],
                          (dm // 2, height, width))
    ch = jnp.broadcast_to(jnp.cos(pos_h * div_term).T[:, :, None],
                          (dm // 2, height, width))

    pe = jnp.zeros((1, d_model, height, width), dtype=jnp.float32)
    pe = pe.at[0, 0:dm:2].set(sw)
    pe = pe.at[0, 1:dm:2].set(cw)
    pe = pe.at[0, dm::2].set(sh)
    pe = pe.at[0, dm + 1::2].set(ch)
    return pe


def prepare_pe_flat(pe_nchw: jnp.ndarray, batch: int,
                    dtype=jnp.float32) -> jnp.ndarray:
    """One-time (cached) preprocessing of the constant pe buffer.

    rearrange 'b c h w -> (h w) c', tile over the batch axis and cast, so the
    forward kernel is a plain lane-dense 2D add on (h*w, batch*d_model).
    Hoisted out of the forward path since pe never changes.
    """
    _, c, H, W = pe_nchw.shape
    pe_2d = jnp.transpose(pe_nchw[0], (1, 2, 0)).reshape(H * W, c)   # (h*w, c)
    # Row layout of x.reshape(n, b*c) is [b0_c0..b0_c(c-1), b1_c0..], so the
    # pe row is simply repeated `batch` times along the lane axis.
    return jnp.tile(pe_2d, (1, batch)).astype(dtype)                 # (h*w, b*c)


# --------------------------------------------------------------------------
# Pallas kernel: lane-dense broadcast-add of the positional encoding.
# --------------------------------------------------------------------------
def _add_pe_kernel(x_ref, pe_ref, o_ref):
    # x_ref / pe_ref / o_ref: (tile_n, b*c) — plain 2D add, full-width stores.
    o_ref[...] = (x_ref[...] + pe_ref[...]).astype(o_ref.dtype)


def _pick_tile_n(n: int, row_bytes: int) -> int:
    """Single block if it fits; otherwise ~4 MiB blocks along n (2 inputs x 2
    pipeline buffers + double-buffered output stays well inside the 32 MiB
    scoped-VMEM default on v6e/v7x)."""
    budget = 4 << 20
    if n * row_bytes <= budget:
        return n
    cap = max(8, (budget // max(row_bytes, 1)) // 8 * 8)
    t = min(cap, (n // 8) * 8)
    while t >= 8:
        if n % t == 0:
            return t
        t -= 8
    return n  # no clean divisor: fall back to one full block


def positional_encoding_2d(x: jnp.ndarray, pe_flat: jnp.ndarray,
                           h: int, w: int, nbc: bool = True,
                           donate_x: bool = False) -> jnp.ndarray:
    """Forward pass. x: [n, b, c] with n == h*w (nbc=True path).

    pe_flat must be the cached output of prepare_pe_flat(pe, batch=x.shape[1]).
    Set donate_x=True only if the caller donates x's buffer (enables in-place
    output); otherwise the forced alias would add a defensive copy.
    """
    if h != 16 or w != 16:
        # TODO(synk): bicubic F.interpolate of the pe buffer has no exact Pallas
        # equivalent (PyTorch bicubic a=-0.75); only the native 16x16 grid here.
        raise NotImplementedError("only h=w=16 supported")
    if not nbc:
        # TODO(synk): nbc=False ('b (h w) c') path not exercised by AWCC; the
        # kernel covers the documented nbc=True layout only.
        raise NotImplementedError("only nbc=True supported")

    n, b, c = x.shape
    bc = b * c
    assert pe_flat.shape == (n, bc), (pe_flat.shape, (n, bc))

    pe_flat = pe_flat.astype(x.dtype)   # no-op when prepared in x.dtype
    x2 = x.reshape(n, bc)               # contiguous view: free

    row_bytes = bc * jnp.dtype(x.dtype).itemsize
    tile_n = _pick_tile_n(n, row_bytes)
    grid = (n // tile_n,)

    out2 = pl.pallas_call(
        _add_pe_kernel,
        out_shape=jax.ShapeDtypeStruct((n, bc), x.dtype),
        grid_spec=pl.GridSpec(
            grid=grid,
            in_specs=[
                pl.BlockSpec((tile_n, bc), lambda i: (i, 0)),
                pl.BlockSpec((tile_n, bc), lambda i: (i, 0)),
            ],
            out_specs=pl.BlockSpec((tile_n, bc), lambda i: (i, 0)),
        ),
        input_output_aliases=({0: 0} if donate_x else {}),
        compiler_params=pltpu.CompilerParams(
            dimension_semantics=("parallel",),
            vmem_limit_bytes=32 << 20,
        ),
    )(x2, pe_flat)

    return out2.reshape(n, b, c)


if __name__ == "__main__":
    d_model = 64          # divisible by 4; batch*d_model = 128 -> full lane width
    h = w = 16
    batch = 2
    n = h * w

    # "module init": build the constant pe buffer and cache its flat form once.
    pe_nchw = make_pe(d_model, h, w)                        # (1, d_model, 16, 16)
    pe_flat = prepare_pe_flat(pe_nchw, batch, jnp.float32)  # (256, 128)

    key = jax.random.PRNGKey(0)
    x = jax.random.normal(key, (n, batch, d_model), dtype=jnp.float32)

    # pure-JAX reference of the PyTorch forward
    ref = x + jnp.transpose(pe_nchw[0], (1, 2, 0)).reshape(n, 1, d_model)

    out = positional_encoding_2d(x, pe_flat, h, w, nbc=True)
    out = jax.block_until_ready(out)

    assert out.shape == (n, batch, d_model)
    assert jnp.allclose(out, ref, atol=1e-6), "mismatch vs reference"

    print("KERNEL_OK")
</pallas_src>

<mosaic_0001>
module attributes {stable_mosaic.version = 11 : i64} {
  func.func @_add_pe_kernel(%arg0: i32, %arg1: memref<256x128xf32, #tpu.memory_space<vmem>>, %arg2: memref<256x128xf32, #tpu.memory_space<vmem>>, %arg3: memref<256x128xf32, #tpu.memory_space<vmem>>) attributes {dimension_semantics = [#tpu.dimension_semantics<parallel>], iteration_bounds = array<i64: 1>, scalar_prefetch = 0 : i64, scratch_operands = 0 : i64, tpu.core_type = #tpu.core_type<tc>, window_params = [{transform_indices = @transform_0, window_bounds = array<i64: 256, 128>}, {transform_indices = @transform_1, window_bounds = array<i64: 256, 128>}, {transform_indices = @transform_2, window_bounds = array<i64: 256, 128>}]} {
    %c0 = arith.constant 0 : index
    %c0_0 = arith.constant 0 : index
    %0 = vector.load %arg1[%c0, %c0_0] : memref<256x128xf32, #tpu.memory_space<vmem>>, vector<256x128xf32>
    %c0_1 = arith.constant 0 : index
    %c0_2 = arith.constant 0 : index
    %1 = vector.load %arg2[%c0_1, %c0_2] : memref<256x128xf32, #tpu.memory_space<vmem>>, vector<256x128xf32>
    %2 = arith.addf %0, %1 : vector<256x128xf32>
    %c0_3 = arith.constant 0 : index
    %c0_4 = arith.constant 0 : index
    %3 = vector.load %arg3[%c0_3, %c0_4] : memref<256x128xf32, #tpu.memory_space<vmem>>, vector<256x128xf32>
    tpu.vector_store %arg3[%c0_3, %c0_4], %2 {strides = array<i32>} : memref<256x128xf32, #tpu.memory_space<vmem>>, vector<256x128xf32>,
    return
  }
  func.func @transform_0(%arg0: i32) -> (i32, i32) {
    %c0_i32 = arith.constant 0 : i32
    %c0_i32_0 = arith.constant 0 : i32
    return %arg0, %c0_i32 : i32, i32
  }
  func.func @transform_1(%arg0: i32) -> (i32, i32) {
    %c0_i32 = arith.constant 0 : i32
    %c0_i32_0 = arith.constant 0 : i32
    return %arg0, %c0_i32 : i32, i32
  }
  func.func @transform_2(%arg0: i32) -> (i32, i32) {
    %c0_i32 = arith.constant 0 : i32
    %c0_i32_0 = arith.constant 0 : i32
    return %arg0, %c0_i32 : i32, i32
  }
}

</mosaic_0001>

<bundles_post_ra>
// kernel: tpu_custom_call.1
= control target key start
LH: loop header
LB: loop body
LE: loop exit
PB: predicated region body
PF: predicated region fallthrough
CT: control target
= control target key end

     0   :  { %7 = vsyncpa [#allocation3], 0  ;;  %s295_s0 = inlined_call_operand.hbm [shape: f32[256,128], index: 0, kind: input, shape index: {}]   ;;  %s296_s1 = inlined_call_operand.hbm [shape: f32[256,128], index: 1, kind: input, shape index: {}]   ;;  %s297_s2 = inlined_call_operand.hbm [shape: f32[256,128], index: 2, kind: output, shape index: {}]  }
   0x1   :  { %8 = vsyncpa [#allocation6], 0 }
   0x2   :  { %9 = vsyncpa [#allocation4], 0  ;;  %s257_s9 = smov [#allocation2]  }
   0x3   :  { %s15_s10 = sshll.u32 %s257_s9, 4  ;;  %s16_s10 = int_to_ptr.vmem [resolvable:$true] %s15_s10 }
   0x4   :  { %s199_s11 = scalar_lea.vmem %s16_s10, 4096  ;;  %p204_p1 = scmp.lt.s32.totalorder %s16_s10, %s16_s10 }
   0x5   :  { %p200_p0 = scmp.ne.s32.totalorder %s16_s10, %s199_s11  ;;  %p205_p2 = scmp.lt.s32.totalorder %s199_s11, %s199_s11 }
   0x7   :  { %p206_p3 = por %p205_p2, %p204_p1 }
   0x9   :  { %p207_p4 = pnand %p206_p3, %p200_p0 }
   0xb   :  { %210 = shalt.err (!%p207_p4)
}
   0xc   :  { %s258_s12 = smov 128   ;;  %s259_s13 = smov 8  }
   0xd   :  { %21 = dma.hbm_to_vmem [thread:$0]  %s295_s0, 4096, %s16_s10, [#allocation3], %s258_s12, %s258_s12, %s259_s13  }
   0xe   :  { %s260_s16 = smov [#allocation5]  }
   0xf   :  { %s27_s17 = sshll.u32 %s260_s16, 4  ;;  %s28_s17 = int_to_ptr.vmem [resolvable:$true] %s27_s17 }
  0x10   :  { %s219_s18 = scalar_lea.vmem %s28_s17, 4096  ;;  %p224_p6 = scmp.lt.s32.totalorder %s28_s17, %s28_s17 }
  0x11   :  { %p220_p5 = scmp.ne.s32.totalorder %s28_s17, %s219_s18  ;;  %p225_p7 = scmp.lt.s32.totalorder %s219_s18, %s219_s18 }
  0x13   :  { %p226_p8 = por %p225_p7, %p224_p6 }
  0x15   :  { %p227_p9 = pnand %p226_p8, %p220_p5 }
  0x17   :  { %230 = shalt.err (!%p227_p9)
}
  0x18   :  { %33 = dma.hbm_to_vmem [thread:$0]  %s296_s1, 4096, %s28_s17, [#allocation6], %s258_s12, %s258_s12, %s259_s13  }
  0x19   :  { %251 = dma.done.wait [#allocation3], 4096  }
  0x1a   :  { %252 = vsyncadd [#allocation3], 4294963200 }
  0x1b   :  { %253 = dma.done.wait [#allocation6], 4096  }
  0x1c   :  { %254 = vsyncadd [#allocation6], 4294963200  ;;  %v40_v0 = vld [vmem:[#allocation2] sm:$0xff]  ;;  %v41_v2 = vld [vmem:[#allocation2 + $0x8] sm:$0xff]  ;;  %s261_s0 = smov [#allocation7]  }
  0x1d   :  { %v72_v1 = vld [vmem:[#allocation5] sm:$0xff]  ;;  %v73_v4 = vld [vmem:[#allocation5 + $0x8] sm:$0xff]  ;;  %v42_v5 = vld [vmem:[#allocation2 + $0x10] sm:$0xff]  ;;  %s173_s1 = sshll.u32 %s261_s0, 4  ;;  %s174_s1 = int_to_ptr.vmem [resolvable:$true] %s173_s1 }
  0x1e   :  { %v104_v3 = vadd.f32 %v72_v1, %v40_v0  ;;  %v74_v6 = vld [vmem:[#allocation5 + $0x10] sm:$0xff]  ;;  %v105_v7 = vadd.f32 %v73_v4, %v41_v2  ;;  %v43_v9 = vld [vmem:[#allocation2 + $0x18] sm:$0xff]  ;;  %v44_v11 = vld [vmem:[#allocation2 + $0x20] sm:$0xff]  ;;  %s231_s21 = scalar_lea.vmem %s174_s1, 4096  ;;  %p236_p11 = scmp.lt.s32.totalorder %s174_s1, %s174_s1 }
  0x1f   :  { %v106_v8 = vadd.f32 %v74_v6, %v42_v5  ;;  %v75_v10 = vld [vmem:[#allocation5 + $0x18] sm:$0xff]  ;;  %v76_v13 = vld [vmem:[#allocation5 + $0x20] sm:$0xff]  ;;  %v45_v14 = vld [vmem:[#allocation2 + $0x28] sm:$0xff]  ;;  %p232_p10 = scmp.ne.s32.totalorder %s174_s1, %s231_s21  ;;  %p237_p12 = scmp.lt.s32.totalorder %s231_s21, %s231_s21 }
  0x20   :  { %136 = vst [vmem:[#allocation7] sm:$0xff] %v104_v3  ;;  %v107_v12 = vadd.f32 %v75_v10, %v43_v9  ;;  %v77_v15 = vld [vmem:[#allocation5 + $0x28] sm:$0xff]  ;;  %137 = vst [vmem:[#allocation7 + $0x8] sm:$0xff] %v105_v7  ;;  %v108_v16 = vadd.f32 %v76_v13, %v44_v11  ;;  %v46_v18 = vld [vmem:[#allocation2 + $0x30] sm:$0xff] }
  0x21   :  { %138 = vst [vmem:[#allocation7 + $0x10] sm:$0xff] %v106_v8  ;;  %v109_v17 = vadd.f32 %v77_v15, %v45_v14  ;;  %v78_v19 = vld [vmem:[#allocation5 + $0x30] sm:$0xff]  ;;  %v47_v20 = vld [vmem:[#allocation2 + $0x38] sm:$0xff]  ;;  %v48_v23 = vld [vmem:[#allocation2 + $0x40] sm:$0xff]  ;;  %p238_p13 = por %p237_p12, %p236_p11 }
  0x22   :  { %139 = vst [vmem:[#allocation7 + $0x18] sm:$0xff] %v107_v12  ;;  %v110_v21 = vadd.f32 %v78_v19, %v46_v18  ;;  %v79_v22 = vld [vmem:[#allocation5 + $0x38] sm:$0xff]  ;;  %v80_v24 = vld [vmem:[#allocation5 + $0x40] sm:$0xff]  ;;  %140 = vst [vmem:[#allocation7 + $0x20] sm:$0xff] %v108_v16 }
  0x23   :  { %141 = vst [vmem:[#allocation7 + $0x28] sm:$0xff] %v109_v17  ;;  %v111_v25 = vadd.f32 %v79_v22, %v47_v20  ;;  %v112_v26 = vadd.f32 %v80_v24, %v48_v23  ;;  %v49_v27 = vld [vmem:[#allocation2 + $0x48] sm:$0xff]  ;;  %v50_v29 = vld [vmem:[#allocation2 + $0x50] sm:$0xff]  ;;  %v51_v32 = vld [vmem:[#allocation2 + $0x58] sm:$0xff]  ;;  %p239_p0 = pnand %p238_p13, %p232_p10 }
  0x24   :  { %v81_v28 = vld [vmem:[#allocation5 + $0x48] sm:$0xff]  ;;  %142 = vst [vmem:[#allocation7 + $0x30] sm:$0xff] %v110_v21  ;;  %v82_v31 = vld [vmem:[#allocation5 + $0x50] sm:$0xff]  ;;  %v83_v33 = vld [vmem:[#allocation5 + $0x58] sm:$0xff] }
  0x25   :  { %v113_v30 = vadd.f32 %v81_v28, %v49_v27  ;;  %143 = vst [vmem:[#allocation7 + $0x38] sm:$0xff] %v111_v25  ;;  %144 = vst [vmem:[#allocation7 + $0x40] sm:$0xff] %v112_v26  ;;  %v114_v34 = vadd.f32 %v82_v31, %v50_v29  ;;  %v115_v35 = vadd.f32 %v83_v33, %v51_v32  ;;  %v52_v36 = vld [vmem:[#allocation2 + $0x60] sm:$0xff]  ;;  %v53_v38 = vld [vmem:[#allocation2 + $0x68] sm:$0xff] }
  0x26   :  { %v84_v37 = vld [vmem:[#allocation5 + $0x60] sm:$0xff]  ;;  %v85_v40 = vld [vmem:[#allocation5 + $0x68] sm:$0xff]  ;;  %v54_v41 = vld [vmem:[#allocation2 + $0x70] sm:$0xff] }
  0x27   :  { %145 = vst [vmem:[#allocation7 + $0x48] sm:$0xff] %v113_v30  ;;  %v116_v39 = vadd.f32 %v84_v37, %v52_v36  ;;  %v86_v42 = vld [vmem:[#allocation5 + $0x70] sm:$0xff]  ;;  %146 = vst [vmem:[#allocation7 + $0x50] sm:$0xff] %v114_v34  ;;  %v117_v43 = vadd.f32 %v85_v40, %v53_v38  ;;  %v55_v45 = vld [vmem:[#allocation2 + $0x78] sm:$0xff] }
  0x28   :  { %147 = vst [vmem:[#allocation7 + $0x58] sm:$0xff] %v115_v35  ;;  %v118_v44 = vadd.f32 %v86_v42, %v54_v41  ;;  %v87_v46 = vld [vmem:[#allocation5 + $0x78] sm:$0xff]  ;;  %v56_v47 = vld [vmem:[#allocation2 + $0x80] sm:$0xff]  ;;  %v57_v50 = vld [vmem:[#allocation2 + $0x88] sm:$0xff] }
  0x29   :  { %148 = vst [vmem:[#allocation7 + $0x60] sm:$0xff] %v116_v39  ;;  %v119_v48 = vadd.f32 %v87_v46, %v55_v45  ;;  %v88_v49 = vld [vmem:[#allocation5 + $0x80] sm:$0xff]  ;;  %v89_v51 = vld [vmem:[#allocation5 + $0x88] sm:$0xff]  ;;  %149 = vst [vmem:[#allocation7 + $0x68] sm:$0xff] %v117_v43 }
  0x2a   :  { %150 = vst [vmem:[#allocation7 + $0x70] sm:$0xff] %v118_v44  ;;  %v120_v52 = vadd.f32 %v88_v49, %v56_v47  ;;  %v121_v53 = vadd.f32 %v89_v51, %v57_v50  ;;  %v58_v54 = vld [vmem:[#allocation2 + $0x90] sm:$0xff]  ;;  %v59_v56 = vld [vmem:[#allocation2 + $0x98] sm:$0xff]  ;;  %v60_v59 = vld [vmem:[#allocation2 + $0xa0] sm:$0xff] }
  0x2b   :  { %v90_v55 = vld [vmem:[#allocation5 + $0x90] sm:$0xff]  ;;  %151 = vst [vmem:[#allocation7 + $0x78] sm:$0xff] %v119_v48  ;;  %v91_v58 = vld [vmem:[#allocation5 + $0x98] sm:$0xff]  ;;  %v92_v60 = vld [vmem:[#allocation5 + $0xa0] sm:$0xff] }
  0x2c   :  { %v122_v57 = vadd.f32 %v90_v55, %v58_v54  ;;  %152 = vst [vmem:[#allocation7 + $0x80] sm:$0xff] %v120_v52  ;;  %153 = vst [vmem:[#allocation7 + $0x88] sm:$0xff] %v121_v53  ;;  %v123_v61 = vadd.f32 %v91_v58, %v59_v56  ;;  %v124_v62 = vadd.f32 %v92_v60, %v60_v59  ;;  %v61_v63 = vld [vmem:[#allocation2 + $0xa8] sm:$0xff]  ;;  %v62_v1 = vld [vmem:[#allocation2 + $0xb0] sm:$0xff] }
  0x2d   :  { %v93_v0 = vld [vmem:[#allocation5 + $0xa8] sm:$0xff]  ;;  %v94_v3 = vld [vmem:[#allocation5 + $0xb0] sm:$0xff]  ;;  %v63_v4 = vld [vmem:[#allocation2 + $0xb8] sm:$0xff] }
  0x2e   :  { %154 = vst [vmem:[#allocation7 + $0x90] sm:$0xff] %v122_v57  ;;  %v125_v2 = vadd.f32 %v93_v0, %v61_v63  ;;  %v95_v5 = vld [vmem:[#allocation5 + $0xb8] sm:$0xff]  ;;  %155 = vst [vmem:[#allocation7 + $0x98] sm:$0xff] %v123_v61  ;;  %v126_v6 = vadd.f32 %v94_v3, %v62_v1  ;;  %v64_v8 = vld [vmem:[#allocation2 + $0xc0] sm:$0xff] }
  0x2f   :  { %156 = vst [vmem:[#allocation7 + $0xa0] sm:$0xff] %v124_v62  ;;  %v127_v7 = vadd.f32 %v95_v5, %v63_v4  ;;  %v96_v9 = vld [vmem:[#allocation5 + $0xc0] sm:$0xff]  ;;  %v65_v10 = vld [vmem:[#allocation2 + $0xc8] sm:$0xff]  ;;  %v66_v13 = vld [vmem:[#allocation2 + $0xd0] sm:$0xff] }
  0x30   :  { %157 = vst [vmem:[#allocation7 + $0xa8] sm:$0xff] %v125_v2  ;;  %v128_v11 = vadd.f32 %v96_v9, %v64_v8  ;;  %v97_v12 = vld [vmem:[#allocation5 + $0xc8] sm:$0xff]  ;;  %v98_v14 = vld [vmem:[#allocation5 + $0xd0] sm:$0xff]  ;;  %158 = vst [vmem:[#allocation7 + $0xb0] sm:$0xff] %v126_v6 }
  0x31   :  { %159 = vst [vmem:[#allocation7 + $0xb8] sm:$0xff] %v127_v7  ;;  %v129_v15 = vadd.f32 %v97_v12, %v65_v10  ;;  %v130_v16 = vadd.f32 %v98_v14, %v66_v13  ;;  %v67_v17 = vld [vmem:[#allocation2 + $0xd8] sm:$0xff]  ;;  %v68_v19 = vld [vmem:[#allocation2 + $0xe0] sm:$0xff]  ;;  %v69_v22 = vld [vmem:[#allocation2 + $0xe8] sm:$0xff] }
  0x32   :  { %v99_v18 = vld [vmem:[#allocation5 + $0xd8] sm:$0xff]  ;;  %160 = vst [vmem:[#allocation7 + $0xc0] sm:$0xff] %v128_v11  ;;  %v100_v21 = vld [vmem:[#allocation5 + $0xe0] sm:$0xff]  ;;  %v101_v23 = vld [vmem:[#allocation5 + $0xe8] sm:$0xff] }
  0x33   :  { %v131_v20 = vadd.f32 %v99_v18, %v67_v17  ;;  %161 = vst [vmem:[#allocation7 + $0xc8] sm:$0xff] %v129_v15  ;;  %162 = vst [vmem:[#allocation7 + $0xd0] sm:$0xff] %v130_v16  ;;  %v132_v24 = vadd.f32 %v100_v21, %v68_v19  ;;  %v133_v25 = vadd.f32 %v101_v23, %v69_v22  ;;  %v70_v26 = vld [vmem:[#allocation2 + $0xf0] sm:$0xff]  ;;  %v71_v28 = vld [vmem:[#allocation2 + $0xf8] sm:$0xff] }
  0x34   :  { %v102_v27 = vld [vmem:[#allocation5 + $0xf0] sm:$0xff]  ;;  %v103_v30 = vld [vmem:[#allocation5 + $0xf8] sm:$0xff] }
  0x35   :  { %163 = vst [vmem:[#allocation7 + $0xd8] sm:$0xff] %v131_v20  ;;  %v134_v29 = vadd.f32 %v102_v27, %v70_v26  ;;  %164 = vst [vmem:[#allocation7 + $0xe0] sm:$0xff] %v132_v24  ;;  %v135_v31 = vadd.f32 %v103_v30, %v71_v28 }
  0x36   :  { %165 = vst [vmem:[#allocation7 + $0xe8] sm:$0xff] %v133_v25 }
  0x37   :  { %166 = vst [vmem:[#allocation7 + $0xf0] sm:$0xff] %v134_v29  ;;  %167 = vst [vmem:[#allocation7 + $0xf8] sm:$0xff] %v135_v31 }
  0x38   :  { %242 = shalt.err (!%p239_p0)
}
  0x39   :  { %179 = dma.vmem_to_hbm [thread:$0]  %s174_s1, 4096, %s297_s2, [#allocation4], %s258_s12, %s258_s12, %s259_s13  }
  0x3a   :  { %255 = dma.done.wait [#allocation4], 4096  }
  0x3b   :  { %256 = vsyncadd [#allocation4], 4294963200 }
  0x3c   :  { %183 = vsyncpa [#allocation3], 1 }
  0x3d   :  { %184 = vsyncpa [#allocation6], 1 }
  0x3e   :  { %185 = vsyncpa [#allocation4], 1 }

</bundles_post_ra>
